<compile_context>
chip_gen: v7x
topology: tpu7x:2x2x1
jax: 0.10.0
libtpu: 0.0.40
codegen_flags: <defaults>
</compile_context>

<pallas_src>
import functools

import jax
import jax.numpy as jnp
from jax.experimental import pallas as pl
from jax.experimental.pallas import tpu as pltpu


def _head_kernel(x_ref, w_ref, o_ref, *, block_b, seq, head_size):
    """One grid step = `block_b` batch elements.

    x_ref : (block_b*T, C)  bf16 VMEM   (batch/seq collapsed into matmul M)
    w_ref : (3, C, H)       bf16 VMEM   ([Wk, Wq*scale, Wv])
    o_ref : (block_b*T, H)  f32  VMEM   (direct tile store, full sublanes)
    """
    T, H = seq, head_size

    x = x_ref[...]                                                # (M, C) bf16

    # Three projections sharing the single x load.  w_ref[j] is a (C, H) view
    # at lane offset 0 — no lane-extract from a fused (M, 3H) slab.
    k = jnp.dot(x, w_ref[0], preferred_element_type=jnp.float32)  # (M, H)
    q = jnp.dot(x, w_ref[1], preferred_element_type=jnp.float32)  # (M, H) pre-scaled
    v = jnp.dot(x, w_ref[2], preferred_element_type=jnp.float32)  # (M, H)

    # Split M back into (block_b, T): T is a multiple of 8 here, so the f32
    # sublane split is tile-aligned (no relayout).  bf16 only for MXU inputs.
    kb = k.reshape(block_b, T, H).astype(jnp.bfloat16)
    qb = q.reshape(block_b, T, H).astype(jnp.bfloat16)
    vb = v.reshape(block_b, T, H).astype(jnp.bfloat16)

    # Causal mask as one additive *finite* bias; built once per grid step
    # (grid is normally a single step).  Scores stay f32, so -1e30 is safe.
    row = jax.lax.broadcasted_iota(jnp.int32, (T, T), 0)
    col = jax.lax.broadcasted_iota(jnp.int32, (T, T), 1)
    bias = jnp.where(row >= col, 0.0, -1e30).astype(jnp.float32)  # (T, T)

    # Batched scores: q @ k^T contracting on H (no materialized transpose).
    s = jnp.einsum("bqd,bkd->bqk", qb, kb,
                   preferred_element_type=jnp.float32)            # (b, T, T)
    s = s + bias[None]

    # Numerically-stable softmax in f32; reciprocal on the (idle) EUP slot.
    m = jnp.max(s, axis=-1, keepdims=True)
    p = jnp.exp(s - m)
    denom = jnp.sum(p, axis=-1, keepdims=True)
    p = (p * pl.reciprocal(denom, approx=True)).astype(jnp.bfloat16)

    # Dropout is identity in eval mode / p = 0.0.
    # TODO(synk): training-mode dropout RNG not implemented.

    out = jnp.einsum("bqk,bkd->bqd", p, vb,
                     preferred_element_type=jnp.float32)          # (b, T, H)

    # Direct store: merge (block_b, T) back into the sublane axis and write the
    # whole (block_b*T, H) tile at once.
    o_ref[...] = out.reshape(block_b * T, H).astype(o_ref.dtype)


def _single_tensorcore_chip():
    """True for v5e/v6e-class chips (1 TensorCore); False for v7x (2 TCs)."""
    try:
        kind = jax.devices()[0].device_kind.lower()
    except Exception:  # pragma: no cover - defensive; 1-TC assumption is safe
        return True
    return "7" not in kind


def _pick_block_b(B, T):
    """Default: a single grid step.  Split into 2 'parallel' steps only on a
    multi-TensorCore chip AND when each step still carries >= 128 matmul rows
    (otherwise megacore sharding just duplicates the setup work)."""
    if (not _single_tensorcore_chip()) and B % 2 == 0:
        half = B // 2
        if half * T >= 128 and (half * T) % 16 == 0:  # bf16 sublane packing
            return half
    return B


def head_forward(x, w_key, w_query, w_value, *, block_b=None):
    """x: (B, T, C) float32; w_*: (C, H) float32 (pre-transposed nn.Linear)."""
    B, T, C = x.shape
    H = w_key.shape[1]

    if block_b is None:
        block_b = _pick_block_b(B, T)
    assert B % block_b == 0, "block_b must divide the batch"
    # BlockSpec rule: when taking a partial batch block, the sublane extent of
    # the x/out blocks (block_b*T) must stay divisible by the sublane tile.
    assert block_b == B or (block_b * T) % 8 == 0, (
        "partial batch blocks require block_b*T to be a multiple of 8")

    # Stack the three projection weights as (3, C, H) bf16 (halves weight DMA,
    # MXU accumulates in f32) and fold the attention scale into w_query.
    scale = H ** -0.5
    w = jnp.stack([w_key, w_query * scale, w_value], axis=0).astype(jnp.bfloat16)

    # Collapse (B, T) -> M rows for the projection matmuls; bf16 activations
    # halve the x DMA bytes and its VMEM footprint.
    x2 = x.reshape(B * T, C).astype(jnp.bfloat16)

    kernel = functools.partial(_head_kernel, block_b=block_b, seq=T, head_size=H)

    out = pl.pallas_call(
        kernel,
        out_shape=jax.ShapeDtypeStruct((B * T, H), x.dtype),
        grid_spec=pltpu.PrefetchScalarGridSpec(
            num_scalar_prefetch=0,
            grid=(B // block_b,),
            in_specs=[
                pl.BlockSpec((block_b * T, C), lambda i: (i, 0)),
                pl.BlockSpec((3, C, H), lambda i: (0, 0, 0)),
            ],
            out_specs=pl.BlockSpec((block_b * T, H), lambda i: (i, 0)),
        ),
        compiler_params=pltpu.CompilerParams(
            dimension_semantics=("parallel",),
            # For larger T/C, raise vmem_limit_bytes here (default scoped limit
            # is well below physical VMEM; budget against v7x's 64 MiB).
        ),
    )(x2, w)

    return out.reshape(B, T, H)


def head_reference(x, w_key, w_query, w_value):
    """Pure-JAX f32 reference matching the PyTorch forward (eval mode)."""
    H = w_key.shape[1]
    k = x @ w_key
    q = x @ w_query
    v = x @ w_value
    wei = (q @ jnp.swapaxes(k, -2, -1)) * (H ** -0.5)
    T = x.shape[1]
    tril = jnp.tril(jnp.ones((T, T), dtype=bool))
    wei = jnp.where(tril[None, :, :], wei, -jnp.inf)
    wei = jax.nn.softmax(wei, axis=-1)
    return wei @ v


if __name__ == "__main__":
    # Module hyperparameters (small, consistent with the forward pass).
    B, T = 2, 8            # batch, sequence length (T <= block_size)
    n_embd = 32            # C
    head_size = 16         # H
    block_size = 8
    dropout = 0.0

    key = jax.random.PRNGKey(0)
    kx, kk, kq, kv = jax.random.split(key, 4)

    x = jax.random.normal(kx, (B, T, n_embd), dtype=jnp.float32)

    # Deterministic init mimicking nn.Linear default U(-1/sqrt(in), 1/sqrt(in)).
    bound = 1.0 / (n_embd ** 0.5)
    # Stored as (C, H): the transpose of PyTorch's (H, C) weight.
    w_key = jax.random.uniform(kk, (n_embd, head_size), jnp.float32, -bound, bound)
    w_query = jax.random.uniform(kq, (n_embd, head_size), jnp.float32, -bound, bound)
    w_value = jax.random.uniform(kv, (n_embd, head_size), jnp.float32, -bound, bound)

    out = head_forward(x, w_key, w_query, w_value)
    out = jax.block_until_ready(out)

    ref = head_reference(x, w_key, w_query, w_value)
    assert out.shape == (B, T, head_size)
    # bf16 MXU inputs (f32 accumulation) vs the pure-f32 reference.
    assert jnp.allclose(out, ref, atol=5e-2, rtol=5e-2), (
        "mismatch vs reference: max abs err "
        f"{float(jnp.max(jnp.abs(out - ref)))}")

    print("KERNEL_OK")
</pallas_src>

<mosaic_0001>
module attributes {stable_mosaic.version = 11 : i64} {
  func.func @_head_kernel(%arg0: i32, %arg1: memref<16x32xbf16, #tpu.memory_space<vmem>>, %arg2: memref<3x32x16xbf16, #tpu.memory_space<vmem>>, %arg3: memref<16x16xf32, #tpu.memory_space<vmem>>) attributes {dimension_semantics = [#tpu.dimension_semantics<parallel>], iteration_bounds = array<i64: 1>, scalar_prefetch = 0 : i64, scratch_operands = 0 : i64, tpu.core_type = #tpu.core_type<tc>, window_params = [{transform_indices = @transform_0, window_bounds = array<i64: 16, 32>}, {pipeline_mode = #tpu.pipeline_mode<synchronous>, transform_indices = @transform_1, window_bounds = array<i64: 3, 32, 16>}, {transform_indices = @transform_2, window_bounds = array<i64: 16, 16>}]} {
    %c0 = arith.constant 0 : index
    %c0_0 = arith.constant 0 : index
    %0 = vector.load %arg1[%c0, %c0_0] : memref<16x32xbf16, #tpu.memory_space<vmem>>, vector<16x32xbf16>
    %c0_1 = arith.constant 0 : index
    %c0_2 = arith.constant 0 : index
    %c0_3 = arith.constant 0 : index
    %1 = vector.load %arg2[%c0_1, %c0_2, %c0_3] : memref<3x32x16xbf16, #tpu.memory_space<vmem>>, vector<1x32x16xbf16>
    %2 = vector.shape_cast %1 : vector<1x32x16xbf16> to vector<32x16xbf16>
    %cst = arith.constant dense<0.000000e+00> : vector<16x16xf32>
    %3 = tpu.matmul %0, %2, %cst {dimension_numbers = #tpu.dot_dimension_numbers<[1], [0], [0], [1], [0, 0, 1, 1], [], []>} : vector<16x32xbf16>, vector<32x16xbf16>, vector<16x16xf32> -> vector<16x16xf32>
    %c1 = arith.constant 1 : index
    %c0_4 = arith.constant 0 : index
    %c0_5 = arith.constant 0 : index
    %4 = vector.load %arg2[%c1, %c0_4, %c0_5] : memref<3x32x16xbf16, #tpu.memory_space<vmem>>, vector<1x32x16xbf16>
    %5 = vector.shape_cast %4 : vector<1x32x16xbf16> to vector<32x16xbf16>
    %cst_6 = arith.constant dense<0.000000e+00> : vector<16x16xf32>
    %6 = tpu.matmul %0, %5, %cst_6 {dimension_numbers = #tpu.dot_dimension_numbers<[1], [0], [0], [1], [0, 0, 1, 1], [], []>} : vector<16x32xbf16>, vector<32x16xbf16>, vector<16x16xf32> -> vector<16x16xf32>
    %c2 = arith.constant 2 : index
    %c0_7 = arith.constant 0 : index
    %c0_8 = arith.constant 0 : index
    %7 = vector.load %arg2[%c2, %c0_7, %c0_8] : memref<3x32x16xbf16, #tpu.memory_space<vmem>>, vector<1x32x16xbf16>
    %8 = vector.shape_cast %7 : vector<1x32x16xbf16> to vector<32x16xbf16>
    %cst_9 = arith.constant dense<0.000000e+00> : vector<16x16xf32>
    %9 = tpu.matmul %0, %8, %cst_9 {dimension_numbers = #tpu.dot_dimension_numbers<[1], [0], [0], [1], [0, 0, 1, 1], [], []>} : vector<16x32xbf16>, vector<32x16xbf16>, vector<16x16xf32> -> vector<16x16xf32>
    %10 = vector.shape_cast %3 : vector<16x16xf32> to vector<2x8x16xf32>
    %11 = arith.truncf %10 : vector<2x8x16xf32> to vector<2x8x16xbf16>
    %12 = vector.shape_cast %6 : vector<16x16xf32> to vector<2x8x16xf32>
    %13 = arith.truncf %12 : vector<2x8x16xf32> to vector<2x8x16xbf16>
    %14 = vector.shape_cast %9 : vector<16x16xf32> to vector<2x8x16xf32>
    %15 = arith.truncf %14 : vector<2x8x16xf32> to vector<2x8x16xbf16>
    %16 = tpu.iota {dimensions = array<i32: 0>} : vector<8x8xi32>
    %17 = tpu.iota {dimensions = array<i32: 1>} : vector<8x8xi32>
    %18 = arith.cmpi sge, %16, %17 : vector<8x8xi32>
    %cst_10 = arith.constant 0.000000e+00 : f32
    %cst_11 = arith.constant -1.000000e+30 : f32
    %19 = vector.broadcast %cst_10 : f32 to vector<8x8xf32>
    %20 = vector.broadcast %cst_11 : f32 to vector<8x8xf32>
    %21 = arith.select %18, %19, %20 : vector<8x8xi1>, vector<8x8xf32>
    "tpu.trace_start"() <{level = 10 : i32, message = "bqd,bkd->bqk"}> : () -> ()
    %cst_12 = arith.constant dense<0.000000e+00> : vector<2x8x8xf32>
    %22 = tpu.matmul %13, %11, %cst_12 {dimension_numbers = #tpu.dot_dimension_numbers<[2], [2], [1], [1], [0, 0, 0, 1, 1, 1], [0], [0]>} : vector<2x8x16xbf16>, vector<2x8x16xbf16>, vector<2x8x8xf32> -> vector<2x8x8xf32>
    "tpu.trace_stop"() : () -> ()
    %23 = vector.shape_cast %21 : vector<8x8xf32> to vector<1x8x8xf32>
    %24 = vector.broadcast %23 : vector<1x8x8xf32> to vector<2x8x8xf32>
    %25 = arith.addf %22, %24 : vector<2x8x8xf32>
    %cst_13 = arith.constant dense<0xFF800000> : vector<2x8xf32>
    %26 = vector.multi_reduction <maximumf>, %25, %cst_13 [2] : vector<2x8x8xf32> to vector<2x8xf32>
    %27 = vector.shape_cast %26 : vector<2x8xf32> to vector<2x8x1xf32>
    %28 = vector.broadcast %27 : vector<2x8x1xf32> to vector<2x8x8xf32>
    %29 = arith.subf %25, %28 : vector<2x8x8xf32>
    %30 = math.exp %29 : vector<2x8x8xf32>
    %cst_14 = arith.constant dense<0.000000e+00> : vector<2x8xf32>
    %31 = vector.multi_reduction <add>, %30, %cst_14 [2] : vector<2x8x8xf32> to vector<2x8xf32>
    %32 = vector.shape_cast %31 : vector<2x8xf32> to vector<2x8x1xf32>
    %33 = tpu.reciprocal %32 {approx = true} : vector<2x8x1xf32> -> vector<2x8x1xf32>
    %34 = vector.broadcast %33 : vector<2x8x1xf32> to vector<2x8x8xf32>
    %35 = arith.mulf %30, %34 : vector<2x8x8xf32>
    %36 = arith.truncf %35 : vector<2x8x8xf32> to vector<2x8x8xbf16>
    "tpu.trace_start"() <{level = 10 : i32, message = "bqk,bkd->bqd"}> : () -> ()
    %cst_15 = arith.constant dense<0.000000e+00> : vector<2x8x16xf32>
    %37 = tpu.matmul %36, %15, %cst_15 {dimension_numbers = #tpu.dot_dimension_numbers<[2], [1], [1], [2], [0, 0, 0, 1, 1, 2], [0], [0]>} : vector<2x8x8xbf16>, vector<2x8x16xbf16>, vector<2x8x16xf32> -> vector<2x8x16xf32>
    "tpu.trace_stop"() : () -> ()
    %38 = vector.shape_cast %37 : vector<2x8x16xf32> to vector<16x16xf32>
    %c0_16 = arith.constant 0 : index
    %c0_17 = arith.constant 0 : index
    %39 = vector.load %arg3[%c0_16, %c0_17] : memref<16x16xf32, #tpu.memory_space<vmem>>, vector<16x16xf32>
    tpu.vector_store %arg3[%c0_16, %c0_17], %38 {strides = array<i32>} : memref<16x16xf32, #tpu.memory_space<vmem>>, vector<16x16xf32>,
    return
  }
  func.func @transform_0(%arg0: i32) -> (i32, i32) {
    %c0_i32 = arith.constant 0 : i32
    %c0_i32_0 = arith.constant 0 : i32
    return %arg0, %c0_i32 : i32, i32
  }
  func.func @transform_1(%arg0: i32) -> (i32, i32, i32) {
    %c0_i32 = arith.constant 0 : i32
    %c0_i32_0 = arith.constant 0 : i32
    %c0_i32_1 = arith.constant 0 : i32
    %c0_i32_2 = arith.constant 0 : i32
    return %c0_i32, %c0_i32_0, %c0_i32_1 : i32, i32, i32
  }
  func.func @transform_2(%arg0: i32) -> (i32, i32) {
    %c0_i32 = arith.constant 0 : i32
    %c0_i32_0 = arith.constant 0 : i32
    return %arg0, %c0_i32 : i32, i32
  }
}

</mosaic_0001>

<bundles_post_ra>
// kernel: tpu_custom_call.1
= control target key start
LH: loop header
LB: loop body
LE: loop exit
PB: predicated region body
PF: predicated region fallthrough
CT: control target
= control target key end

     0   :  { %v570_v1 = vmov 0.0   ;;  %vm571_vm0 = vmmov 0   ;;  %vm36_vm1 = vcmask 261120   ;;  %s660_s0 = inlined_call_operand.vmem [shape: bf16[16,32], index: 0, kind: input, shape index: {}]   ;;  %s661_s1 = inlined_call_operand.vmem [shape: bf16[3,32,16], index: 1, kind: input, shape index: {}]   ;;  %s662_s2 = inlined_call_operand.hbm [shape: f32[16,16], index: 2, kind: output, shape index: {}]  }
   0x1   :  { %v531_v0 = vld [vmem:[%s661_s1] sm:$0xff]   ;;  %477 = vmatprep.subr.bf16.mxu0 %v570_v1  ;;  %v532_v2 = vld [vmem:[%s661_s1 + $0x8] sm:$0xff]   ;;  %485 = vmatprep.subr.bf16.mxu1 %v570_v1  ;;  %v533_v3 = vld [vmem:[%s661_s1 + $0x10] sm:$0xff]  }
   0x2   :  { %478 = vmatpush3.bf16.msra.mxu0 %v531_v0  ;;  %481 = vmatprep.mubr.msk.bf16.mxu0 %vm571_vm0, %v570_v1  ;;  %v535_v4 = vld [vmem:[%s661_s1 + $0x18] sm:$0xff]   ;;  %v534_v5 = vld [vmem:[%s660_s0] sm:$0xff]  }
   0x3   :  { %479 = vmatprep.subr.bf16.mxu0 %v570_v1  ;;  %489 = vmatprep.mubr.msk.bf16.mxu1 %vm571_vm0, %v570_v1  ;;  %v536_v6 = vld [vmem:[%s661_s1 + $0x20] sm:$0xff]  }
   0x4   :  { %486 = vmatpush3.bf16.msra.mxu1 %v533_v3 }
   0x5   :  { %487 = vmatprep.subr.bf16.mxu1 %v570_v1 }
   0x6   :  { %480 = vmatpush3.bf16.msra.mxu0 %v532_v2 }
   0x7   :  { %493 = vmatprep.subr.bf16.mxu0 %v570_v1 }
   0x8   :  { %7 = vsyncpa [#allocation3], 0  ;;  %488 = vmatpush3.bf16.msra.mxu1 %v535_v4  ;;  %v537_v7 = vld [vmem:[%s661_s1 + $0x28] sm:$0xff]   ;;  %vm209_vm2 = vcmask 130048   ;;  %vm330_vm3 = vcmask 1043456   ;;  %v203_v30 = vlaneseq  ;;  %vm302_vm5 = vcmask 64512  }
   0x9   :  { %482 = vmatmul.mubr.msk.bf16.vlgmr.msra.gmra.mrb[0].mxu0 %vm36_vm1, %v534_v5  ;;  %501 = vmatprep.subr.bf16.mxu1 %v570_v1  ;;  %v572_v33 = vmov -1e+30   ;;  %s573_s0 = smov [#allocation2]  }
   0xa   :  { %494 = vmatpush3.bf16.msra.mxu0 %v536_v6  ;;  %497 = vmatprep.mubr.msk.bf16.mxu0 %vm571_vm0, %v570_v1  ;;  %v204_v31 = vshrl.u32 %v203_v30, 7  ;;  %v206_v32 = vand.u32 127, %v203_v30  ;;  %s427_s1 = sshll.u32 %s573_s0, 4  ;;  %s428_s1 = int_to_ptr.vmem [resolvable:$true] %s427_s1 }
   0xb   :  { %490 = vmatmul.mubr.msk.bf16.vlgmr.msra.gmra.mrb[0].mxu1 %vm36_vm1, %v534_v5  ;;  %495 = vmatprep.subr.bf16.mxu0 %v570_v1  ;;  %s546_s23 = scalar_lea.vmem %s428_s1, 256  ;;  %p551_p1 = scmp.lt.s32.totalorder %s428_s1, %s428_s1 }
   0xc   :  { %503 = vmatprep.mubr.msk.bf16.mxu1 %vm571_vm0, %v570_v1  ;;  %vm207_vm4 = vcmp.ge.s32.totalorder %v204_v31, %v206_v32  ;;  %p547_p0 = scmp.ne.s32.totalorder %s428_s1, %s546_s23  ;;  %p552_p2 = scmp.lt.s32.totalorder %s546_s23, %s546_s23 }
   0xd   :  { %v208_v34 = vsel %vm207_vm4, 0.0, %v572_v33 }
   0xe   :  { %496 = vmatpush3.bf16.msra.mxu0 %v537_v7  ;;  %p553_p3 = por %p552_p2, %p551_p1 }
   0xf   :  { %507 = vmatprep.subr.bf16.mxu0 %v570_v1 }
  0x10   :  { %p554_p4 = pnand %p553_p3, %p547_p0 }
  0x11   :  { %498 = vmatmul.mubr.msk.bf16.vlgmr.msra.gmra.mrb[4].mxu0 %vm36_vm1, %v534_v5 }
  0x12   :  { %509 = vmatprep.mubr.msk.bf16.mxu0 %vm571_vm0, %v570_v1 }
  0xdc   :  { %v74_v8 = vpop.f32.mrb[0].mxu0 }
  0xdd   :  { %v197_v9 = vpack.c.bf16 %v74_v8, %v74_v8  ;;  %v483_v10 = vpop.f32.mrb[1].mxu0 }
  0xde   :  { %v77_v11 = vpop.f32.mrb[2].mxu0  ;;  %v132_v12 = vpop.f32.mrb[0].mxu1 }
  0xdf   :  { %v214_v13 = vsel %vm209_vm2, %v197_v9, 0  ;;  %v198_v14 = vpack.c.bf16 %v77_v11, %v77_v11  ;;  %v484_v15 = vpop.f32.mrb[3].mxu0  ;;  %v491_v16 = vpop.f32.mrb[1].mxu1  ;;  %v199_v20 = vpack.c.bf16 %v132_v12, %v132_v12 }
  0xe0   :  { %502 = vmatpush3.bf16.xpose.msra.mxu1 %v214_v13  ;;  %v135_v17 = vpop.f32.mrb[2].mxu1 }
  0xe1   :  { %v260_v18 = vsel %vm209_vm2, %v198_v14, 0  ;;  %v492_v19 = vpop.f32.mrb[3].mxu1  ;;  %513 = vmatprep.subr.bf16.mxu1 %v570_v1  ;;  %v200_v25 = vpack.c.bf16 %v135_v17, %v135_v17 }
  0xe2   :  { %508 = vmatpush3.bf16.xpose.msra.mxu0 %v260_v18 }
  0xe3   :  { %519 = vmatprep.subr.bf16.mxu0 %v570_v1 }
  0xe4   :  { %v190_v21 = vpop.f32.mrb[4].mxu0 }
  0xe5   :  { %v201_v22 = vpack.c.bf16 %v190_v21, %v190_v21  ;;  %v499_v23 = vpop.f32.mrb[5].mxu0 }
  0xe6   :  { %v193_v24 = vpop.f32.mrb[6].mxu0 }
  0xe7   :  { %504 = vmatmul.mubr.msk.bf16.vlgmr.msra.gmra.mrb[4].mxu1 %vm209_vm2, %v199_v20  ;;  %v332_v26 = vsel %vm330_vm3, %v201_v22, 0  ;;  %v202_v27 = vpack.c.bf16 %v193_v24, %v193_v24  ;;  %v500_v28 = vpop.f32.mrb[7].mxu0 }
  0xe8   :  { %514 = vmatpush3.bf16.msra.mxu1 %v332_v26  ;;  %515 = vmatprep.mubr.msk.bf16.mxu1 %vm571_vm0, %v570_v1 }
  0xe9   :  { %510 = vmatmul.mubr.msk.bf16.vlgmr.msra.gmra.mrb[8].mxu0 %vm209_vm2, %v200_v25  ;;  %v378_v29 = vsel %vm330_vm3, %v202_v27, 0 }
  0xea   :  { %520 = vmatpush3.bf16.msra.mxu0 %v378_v29  ;;  %521 = vmatprep.mubr.msk.bf16.mxu0 %vm571_vm0, %v570_v1 }
 0x1ba   :  { %v250_v35 = vpop.f32.mrb[4].mxu1 }
 0x1bb   :  { %v251_v36 = vadd.f32 %v250_v35, %v208_v34  ;;  %v505_v37 = vpop.f32.mrb[5].mxu1 }
 0x1bc   :  { %v253_v38 = vpop.f32.mrb[6].mxu1  ;;  %v296_v39 = vpop.f32.mrb[8].mxu0 }
 0x1bd   :  { %v297_v40 = vadd.f32 %v296_v39, %v208_v34  ;;  %v506_v41 = vpop.f32.mrb[7].mxu1  ;;  %v511_v42 = vpop.f32.mrb[9].mxu0  ;;  %v303_v43 = vsel %vm302_vm5, %v251_v36, -inf }
 0x1be   :  { %304 = vmax.xlane.f32.xlu0 %v303_v43  ;;  %v299_v44 = vpop.f32.mrb[10].mxu0 }
 0x1bf   :  { %v512_v45 = vpop.f32.mrb[11].mxu0  ;;  %v306_v46 = vsel %vm302_vm5, %v297_v40, -inf }
 0x1c2   :  { %307 = vmax.xlane.f32.xlu0 %v306_v46 }
 0x24b   :  { %v305_v47 = vpop.xlane.xlu0 %304 }
 0x24c   :  { %v309_v48 = vsub.f32 %v251_v36, %v305_v47 }
 0x24e   :  { %v311_v49 = vmul.f32 1.442695, %v309_v48 }
 0x24f   :  { %v308_v50 = vpop.xlane.xlu0 %307 }
 0x250   :  { %538 = vpow2.f32 %v311_v49  ;;  %v310_v51 = vsub.f32 %v297_v40, %v308_v50 }
 0x252   :  { %v313_v52 = vmul.f32 1.442695, %v310_v51 }
 0x254   :  { %540 = vpow2.f32 %v313_v52 }
 0x25a   :  { %v539_v53 = vpop.eup %538 }
 0x25b   :  { %v315_v54 = vsel %vm302_vm5, %v539_v53, 0.0 }
 0x25c   :  { %316 = vadd.xlane.f32.xlu1 %v315_v54 }
 0x25e   :  { %v541_v55 = vpop.eup %540 }
 0x25f   :  { %v318_v56 = vsel %vm302_vm5, %v541_v55, 0.0 }
 0x260   :  { %319 = vadd.xlane.f32.xlu1 %v318_v56 }
 0x2e9   :  { %v317_v57 = vpop.xlane.xlu1 %316 }
 0x2ea   :  { %542 = vrcp.f32 %v317_v57 }
 0x2ed   :  { %v320_v58 = vpop.xlane.xlu1 %319 }
 0x2ee   :  { %544 = vrcp.f32 %v320_v58 }
 0x2f4   :  { %v543_v59 = vpop.eup %542 }
 0x2f5   :  { %v323_v60 = vmul.f32 %v543_v59, %v539_v53 }
 0x2f7   :  { %v325_v61 = vpack.c.bf16 %v323_v60, %v323_v60 }
 0x2f8   :  { %v545_v62 = vpop.eup %544 }
 0x2f9   :  { %v324_v63 = vmul.f32 %v545_v62, %v541_v55  ;;  %516 = vmatmul.mubr.msk.bf16.vlgmr.msra.gmra.mrb[8].mxu1 %vm302_vm5, %v325_v61 }
 0x2fb   :  { %v326_v0 = vpack.c.bf16 %v324_v63, %v324_v63 }
 0x2fd   :  { %522 = vmatmul.mubr.msk.bf16.vlgmr.msra.gmra.mrb[12].mxu0 %vm302_vm5, %v326_v0 }
 0x3cc   :  { %v368_v1 = vpop.f32.mrb[8].mxu1 }
 0x3cd   :  { %420 = vst.msk [vmem:[#allocation2] sm:$0xff] %vm209_vm2, %v368_v1  ;;  %v517_v2 = vpop.f32.mrb[9].mxu1 }
 0x3ce   :  { %v371_v3 = vpop.f32.mrb[10].mxu1 }
 0x3cf   :  { %v518_v4 = vpop.f32.mrb[11].mxu1 }
 0x3d0   :  { %v414_v5 = vpop.f32.mrb[12].mxu0 }
 0x3d1   :  { %421 = vst.msk [vmem:[#allocation2 + $0x8] sm:$0xff] %vm209_vm2, %v414_v5  ;;  %v523_v6 = vpop.f32.mrb[13].mxu0 }
 0x3d2   :  { %v417_v7 = vpop.f32.mrb[14].mxu0 }
 0x3d3   :  { %557 = shalt.err (!%p554_p4)
}
 0x3d4   :  { %s558_s26 = scalar_lea.hbm %s662_s2, 256 }
 0x3d5   :  { %p559_p5 = scmp.ne.s32.totalorder %s662_s2, %s558_s26  ;;  %p562_p6 = scmp.lt.u32.totalorder %s558_s26, %s662_s2 }
 0x3d7   :  { %p564_p7 = pnand %p562_p6, %p559_p5 }
 0x3d9   :  { %567 = shalt.err (!%p564_p7)
}
 0x3da   :  { %s574_s3 = smov 128   ;;  %s575_s4 = smov 8   ;;  %v524_v8 = vpop.f32.mrb[15].mxu0 }
 0x3db   :  { %433 = dma.vmem_to_hbm [thread:$0]  %s428_s1, 256, %s662_s2, [#allocation3], %s574_s3, %s574_s3, %s575_s4  }
 0x3dc   :  { %568 = dma.done.wait [#allocation3], 256  }
 0x3dd   :  { %569 = vsyncadd [#allocation3], 4294967040 }
 0x3de   :  { %437 = vsyncpa [#allocation3], 1 }

</bundles_post_ra>
